<compile_context>
chip_gen: v7x
topology: tpu7x:2x2x1
jax: 0.10.0
libtpu: 0.0.40
codegen_flags: <defaults>
</compile_context>

<pallas_src>
import functools

import jax
import jax.numpy as jnp
from jax.experimental import pallas as pl
from jax.experimental.pallas import tpu as pltpu

_LANE = 128


def _round_up(n: int, m: int) -> int:
    return ((n + m - 1) // m) * m


def _pad2d(a, rows: int, cols: int):
    if a.shape == (rows, cols):
        return a
    return jnp.pad(a, ((0, rows - a.shape[0]), (0, cols - a.shape[1])))


def _make_mlp_kernel(n_h_chunks: int, th: int):
    """fc1 -> ReLU -> fc2 over one batch tile; hidden dim in static chunks."""

    def kernel(x_ref, w1_ref, b1_ref, w2_ref, b2_ref, out_ref):
        # Cast the activation tile to bf16 in-kernel (x stays f32 in HBM, so
        # the wrapper never writes a second bf16 copy of x back to HBM).
        x = x_ref[...].astype(w1_ref.dtype)
        acc = jnp.zeros(out_ref.shape, jnp.float32)
        for c in range(n_h_chunks):          # static, compile-time trip count
            lo = c * th
            hi = lo + th
            # fc1 chunk: [TM, Ip](bf16) @ [Ip, TH](bf16) -> f32 accumulate
            h = jnp.dot(x, w1_ref[:, lo:hi], preferred_element_type=jnp.float32)
            # bias + ReLU in f32 (safe on v5e which has no bf16 VPU)
            h = jnp.maximum(h + b1_ref[:, lo:hi], 0.0)
            # fc2 chunk: cast h to bf16 for the MXU, accumulate in f32
            acc = acc + jnp.dot(h.astype(w2_ref.dtype), w2_ref[lo:hi, :],
                                preferred_element_type=jnp.float32)
        out_ref[...] = (acc + b2_ref[...]).astype(out_ref.dtype)

    return kernel


@functools.partial(jax.jit, static_argnames=("out_features", "tile_m"))
def _mlp_forward_padded(x, w1p, b1p, w2p, b2p, *, out_features, tile_m):
    """x: [B, I] (f32); w1p: [Ip, Hp] bf16; b1p: [1, Hp] f32; w2p: [Hp, Op] bf16;
    b2p: [1, Op] f32.  Returns [B, out_features] f32."""
    B, I = x.shape
    Ip, Hp = w1p.shape
    Op = w2p.shape[1]

    # ---- batch tile selection --------------------------------------------
    tile_m = max(16, _round_up(int(tile_m), 16))   # bf16 sublane packing = 16
    TM = min(tile_m, _round_up(B, 16))
    if _round_up(B, 16) >= 32:                     # guarantee >= 2 batch tiles
        TM = min(TM, _round_up((B + 1) // 2, 16))  # (feeds both v7x TCs)
    TM = _round_up(TM, 16)
    if TM >= 256:
        TM = (TM // 256) * 256                     # MXU row granule (v6e/v7x)
    pB = _round_up(B, TM)
    grid_m = pB // TM

    # ---- hidden-dim chunking: bound the live f32 intermediate -------------
    if Hp <= 512:
        TH = Hp
    elif Hp % 512 == 0:
        TH = 512
    elif Hp % 256 == 0:
        TH = 256
    else:
        TH = 128
    n_h = Hp // TH

    # ---- pad x only when needed (cast to bf16 happens in-kernel) ----------
    xp = x if (pB == B and Ip == I) else _pad2d(x, pB, Ip)
    xb = xp.dtype.itemsize

    # ---- VMEM budget & cost hint -------------------------------------------
    w_bytes = (Ip * Hp + Hp * Op) * 2              # bf16 weights, 1 buffer each
    bias_bytes = (Hp + Op) * 4
    x_bytes = 2 * TM * Ip * xb                     # double-buffered x tiles
    o_bytes = 2 * TM * Op * 4                      # double-buffered out tiles
    live_bytes = TM * TH * 4 + TM * Op * 4         # h chunk + f32 accumulator
    need = w_bytes + bias_bytes + x_bytes + o_bytes + live_bytes
    vmem_limit = int(min(64 << 20, max(2 * need + (4 << 20), 16 << 20)))

    cost = pl.CostEstimate(
        flops=2 * pB * Ip * Hp + 2 * pB * Hp * Op,
        transcendentals=0,
        bytes_accessed=pB * Ip * xb + w_bytes + bias_bytes + pB * Op * 4,
    )

    resident = dict(pipeline_mode=pl.Buffered(1))  # constant index_map -> 1 buf

    out_padded = pl.pallas_call(
        _make_mlp_kernel(n_h, TH),
        out_shape=jax.ShapeDtypeStruct((pB, Op), jnp.float32),
        grid_spec=pltpu.PrefetchScalarGridSpec(
            num_scalar_prefetch=0,
            grid=(grid_m,),
            in_specs=[
                pl.BlockSpec((TM, Ip), lambda i: (i, 0)),              # x tile
                pl.BlockSpec((Ip, Hp), lambda i: (0, 0), **resident),  # W1
                pl.BlockSpec((1, Hp), lambda i: (0, 0), **resident),   # b1
                pl.BlockSpec((Hp, Op), lambda i: (0, 0), **resident),  # W2
                pl.BlockSpec((1, Op), lambda i: (0, 0), **resident),   # b2
            ],
            out_specs=pl.BlockSpec((TM, Op), lambda i: (i, 0)),
        ),
        compiler_params=pltpu.CompilerParams(
            dimension_semantics=("parallel",),
            vmem_limit_bytes=vmem_limit,
        ),
        cost_estimate=cost,
    )(xp, w1p, b1p, w2p, b2p)

    return out_padded[:B, :out_features]


class PallasMLP:
    """Pallas TPU equivalent of the PyTorch MLP / MLP_old module."""

    def __init__(self, w1, b1, w2, b2, *, tile_m=512):
        in_f, hid = w1.shape
        out_f = w2.shape[1]
        assert b1.shape == (hid,) and w2.shape == (hid, out_f)
        assert b2.shape == (out_f,)
        Ip, Hp, Op = (_round_up(d, _LANE) for d in (in_f, hid, out_f))
        # Pad + cast ONCE; weights are static across forward calls, so the
        # per-call wrapper never rewrites them to HBM.
        self._w1 = _pad2d(w1, Ip, Hp).astype(jnp.bfloat16)
        self._w2 = _pad2d(w2, Hp, Op).astype(jnp.bfloat16)
        self._b1 = _pad2d(b1.reshape(1, hid).astype(jnp.float32), 1, Hp)
        self._b2 = _pad2d(b2.reshape(1, out_f).astype(jnp.float32), 1, Op)
        self._out_features = out_f
        self._tile_m = int(tile_m)

    def __call__(self, x):
        return _mlp_forward_padded(
            x, self._w1, self._b1, self._w2, self._b2,
            out_features=self._out_features, tile_m=self._tile_m)


def init_linear_params(key, in_features, out_features):
    """Deterministic init mimicking nn.Linear (uniform in +-1/sqrt(fan_in))."""
    k_w, k_b = jax.random.split(key)
    bound = 1.0 / jnp.sqrt(in_features)
    # Stored as [in_features, out_features] (transpose of PyTorch's weight).
    w = jax.random.uniform(
        k_w, (in_features, out_features), jnp.float32, -bound, bound
    )
    b = jax.random.uniform(k_b, (out_features,), jnp.float32, -bound, bound)
    return w, b


if __name__ == "__main__":
    key = jax.random.PRNGKey(0)
    k_x, k_fc1, k_fc2 = jax.random.split(key, 3)

    batch = 64
    input_size = 16
    hidden_size = 32
    output_size = 8

    x = jax.random.normal(k_x, (batch, input_size), jnp.float32)
    w1, b1 = init_linear_params(k_fc1, input_size, hidden_size)
    w2, b2 = init_linear_params(k_fc2, hidden_size, output_size)

    # Default tile_m=512 -> TM is capped at ceil(B/2)=32 rows, giving 2 batch
    # tiles (exercises the pipeline and both v7x TensorCores).
    mlp = PallasMLP(w1, b1, w2, b2, tile_m=512)
    out = jax.block_until_ready(mlp(x))

    # Pure-JAX reference with the same bf16-rounded MXU operands / f32
    # accumulation (same semantics as the PyTorch forward, modulo bf16 cast).
    def r(a):
        return a.astype(jnp.bfloat16).astype(jnp.float32)

    h_ref = jnp.maximum(r(x) @ r(w1) + b1, 0.0)
    ref = r(h_ref) @ r(w2) + b2

    assert out.shape == (batch, output_size)
    assert out.dtype == jnp.float32
    assert jnp.allclose(out, ref, atol=1e-2, rtol=1e-2)

    print("KERNEL_OK")
</pallas_src>

<mosaic_0001>
module attributes {stable_mosaic.version = 11 : i64} {
  func.func @kernel(%arg0: i32, %arg1: memref<32x128xf32, #tpu.memory_space<vmem>>, %arg2: memref<128x128xbf16, #tpu.memory_space<vmem>>, %arg3: memref<1x128xf32, #tpu.memory_space<vmem>>, %arg4: memref<128x128xbf16, #tpu.memory_space<vmem>>, %arg5: memref<1x128xf32, #tpu.memory_space<vmem>>, %arg6: memref<32x128xf32, #tpu.memory_space<vmem>>) attributes {dimension_semantics = [#tpu.dimension_semantics<parallel>], iteration_bounds = array<i64: 2>, scalar_prefetch = 0 : i64, scratch_operands = 0 : i64, tpu.core_type = #tpu.core_type<tc>, window_params = [{transform_indices = @transform_0, window_bounds = array<i64: 32, 128>}, {pipeline_mode = #tpu.pipeline_mode<synchronous>, transform_indices = @transform_1, window_bounds = array<i64: 128, 128>}, {pipeline_mode = #tpu.pipeline_mode<synchronous>, transform_indices = @transform_2, window_bounds = array<i64: 1, 128>}, {pipeline_mode = #tpu.pipeline_mode<synchronous>, transform_indices = @transform_3, window_bounds = array<i64: 128, 128>}, {pipeline_mode = #tpu.pipeline_mode<synchronous>, transform_indices = @transform_4, window_bounds = array<i64: 1, 128>}, {transform_indices = @transform_5, window_bounds = array<i64: 32, 128>}]} {
    %c0 = arith.constant 0 : index
    %c0_0 = arith.constant 0 : index
    %0 = vector.load %arg1[%c0, %c0_0] : memref<32x128xf32, #tpu.memory_space<vmem>>, vector<32x128xf32>
    %1 = arith.truncf %0 : vector<32x128xf32> to vector<32x128xbf16>
    %cst = arith.constant 0.000000e+00 : f32
    %2 = vector.broadcast %cst : f32 to vector<32x128xf32>
    %c0_1 = arith.constant 0 : index
    %c0_2 = arith.constant 0 : index
    %3 = vector.load %arg2[%c0_1, %c0_2] : memref<128x128xbf16, #tpu.memory_space<vmem>>, vector<128x128xbf16>
    %cst_3 = arith.constant dense<0.000000e+00> : vector<32x128xf32>
    %4 = tpu.matmul %1, %3, %cst_3 {dimension_numbers = #tpu.dot_dimension_numbers<[1], [0], [0], [1], [0, 0, 1, 1], [], []>} : vector<32x128xbf16>, vector<128x128xbf16>, vector<32x128xf32> -> vector<32x128xf32>
    %c0_4 = arith.constant 0 : index
    %c0_5 = arith.constant 0 : index
    %5 = vector.load %arg3[%c0_4, %c0_5] : memref<1x128xf32, #tpu.memory_space<vmem>>, vector<1x128xf32>
    %6 = vector.broadcast %5 : vector<1x128xf32> to vector<32x128xf32>
    %7 = arith.addf %4, %6 : vector<32x128xf32>
    %cst_6 = arith.constant 0.000000e+00 : f32
    %8 = vector.broadcast %cst_6 : f32 to vector<32x128xf32>
    %9 = arith.maximumf %7, %8 : vector<32x128xf32>
    %10 = arith.truncf %9 : vector<32x128xf32> to vector<32x128xbf16>
    %c0_7 = arith.constant 0 : index
    %c0_8 = arith.constant 0 : index
    %11 = vector.load %arg4[%c0_7, %c0_8] : memref<128x128xbf16, #tpu.memory_space<vmem>>, vector<128x128xbf16>
    %cst_9 = arith.constant dense<0.000000e+00> : vector<32x128xf32>
    %12 = tpu.matmul %10, %11, %cst_9 {dimension_numbers = #tpu.dot_dimension_numbers<[1], [0], [0], [1], [0, 0, 1, 1], [], []>} : vector<32x128xbf16>, vector<128x128xbf16>, vector<32x128xf32> -> vector<32x128xf32>
    %13 = arith.addf %2, %12 : vector<32x128xf32>
    %c0_10 = arith.constant 0 : index
    %c0_11 = arith.constant 0 : index
    %14 = vector.load %arg5[%c0_10, %c0_11] : memref<1x128xf32, #tpu.memory_space<vmem>>, vector<1x128xf32>
    %15 = vector.broadcast %14 : vector<1x128xf32> to vector<32x128xf32>
    %16 = arith.addf %13, %15 : vector<32x128xf32>
    %c0_12 = arith.constant 0 : index
    %c0_13 = arith.constant 0 : index
    %17 = vector.load %arg6[%c0_12, %c0_13] : memref<32x128xf32, #tpu.memory_space<vmem>>, vector<32x128xf32>
    tpu.vector_store %arg6[%c0_12, %c0_13], %16 {strides = array<i32>} : memref<32x128xf32, #tpu.memory_space<vmem>>, vector<32x128xf32>,
    return
  }
  func.func @transform_0(%arg0: i32) -> (i32, i32) {
    %c0_i32 = arith.constant 0 : i32
    %c0_i32_0 = arith.constant 0 : i32
    return %arg0, %c0_i32 : i32, i32
  }
  func.func @transform_1(%arg0: i32) -> (i32, i32) {
    %c0_i32 = arith.constant 0 : i32
    %c0_i32_0 = arith.constant 0 : i32
    %c0_i32_1 = arith.constant 0 : i32
    return %c0_i32, %c0_i32_0 : i32, i32
  }
  func.func @transform_2(%arg0: i32) -> (i32, i32) {
    %c0_i32 = arith.constant 0 : i32
    %c0_i32_0 = arith.constant 0 : i32
    %c0_i32_1 = arith.constant 0 : i32
    return %c0_i32, %c0_i32_0 : i32, i32
  }
  func.func @transform_3(%arg0: i32) -> (i32, i32) {
    %c0_i32 = arith.constant 0 : i32
    %c0_i32_0 = arith.constant 0 : i32
    %c0_i32_1 = arith.constant 0 : i32
    return %c0_i32, %c0_i32_0 : i32, i32
  }
  func.func @transform_4(%arg0: i32) -> (i32, i32) {
    %c0_i32 = arith.constant 0 : i32
    %c0_i32_0 = arith.constant 0 : i32
    %c0_i32_1 = arith.constant 0 : i32
    return %c0_i32, %c0_i32_0 : i32, i32
  }
  func.func @transform_5(%arg0: i32) -> (i32, i32) {
    %c0_i32 = arith.constant 0 : i32
    %c0_i32_0 = arith.constant 0 : i32
    return %arg0, %c0_i32 : i32, i32
  }
}

</mosaic_0001>

<bundles_post_ra>
// kernel: _mlp_forward_padded.1
= control target key start
LH: loop header
LB: loop body
LE: loop exit
PB: predicated region body
PF: predicated region fallthrough
CT: control target
= control target key end

     0   :  { %s692_s18 = smov 0   ;;  %s776_s0 = inlined_call_operand.vmem [shape: f32[64,128], index: 0, kind: input, shape index: {}]   ;;  %s777_s1 = inlined_call_operand.vmem [shape: bf16[128,128], index: 1, kind: input, shape index: {}]   ;;  %s778_s2 = inlined_call_operand.vmem [shape: f32[1,128], index: 2, kind: input, shape index: {}]   ;;  %s779_s3 = inlined_call_operand.vmem [shape: bf16[128,128], index: 3, kind: input, shape index: {}]   ;;  %s780_s4 = inlined_call_operand.vmem [shape: f32[1,128], index: 4, kind: input, shape index: {}]   ;;  %s781_s5 = inlined_call_operand.vmem [shape: f32[64,128], index: 5, kind: output, shape index: {}]  }
   0x1 LB: > { %s541_s19 = sadd.s32 4294967295, %s660_s18   ;;  %p545_p0 = scmp.ge.s32.totalorder %s660_s18, 1  ;;  %s660_s18 = sphi %s692_s18, %s15_s18  }
   0x2   : > { %p188_p1 = scmp.lt.s32.totalorder %s660_s18, 3 }
   0x4   : > { %p189_p2 = pnand %p545_p0, %p188_p1 }
   0x5   : > { %v638_v0 = vld [vmem:[%s777_s1] sm:$0xff] (!%p189_p2)   ;;  %s546_s22 = sshll.u32 (!%p189_p2), %s541_s19, 2  ;;  %v639_v1 = vld [vmem:[%s777_s1 + $0x8] sm:$0xff] (!%p189_p2)   ;;  %v640_v2 = vld [vmem:[%s777_s1 + $0x10] sm:$0xff] (!%p189_p2)  }
   0x6   : > { %192 = sbr.rel (%p189_p2) target bundleno = 478 (0x1de), region = 40  ;;  %p217_p3 = scmp.lt.s32.totalorder (!%p189_p2), %s546_s22, 7  ;;  %590 = vmatprep.subr.bf16.mxu0 (!%p189_p2), %v638_v0  ;;  %v641_v3 = vld [vmem:[%s777_s1 + $0x18] sm:$0xff] (!%p189_p2)   ;;  %v646_v7 = vld [vmem:[%s779_s3] sm:$0xff] (!%p189_p2)   ;;  %v647_v8 = vld [vmem:[%s779_s3 + $0x8] sm:$0xff] (!%p189_p2)  }
   0x7   : > { %591 = vmatpush3.bf16.msra.mxu0 (!%p189_p2), %v638_v0  ;;  %v642_v9 = vld [vmem:[%s777_s1 + $0x20] sm:$0xff] (!%p189_p2)   ;;  %610 = vmatprep.subr.bf16.mxu1 (!%p189_p2), %v646_v7  ;;  %v648_v10 = vld [vmem:[%s779_s3 + $0x10] sm:$0xff] (!%p189_p2)   ;;  %v643_v11 = vld [vmem:[%s777_s1 + $0x28] sm:$0xff] (!%p189_p2)  }
   0x8   : > { %592 = vmatprep.subr.bf16.mxu0 (!%p189_p2), %v639_v1  ;;  %611 = vmatpush3.bf16.msra.mxu1 (!%p189_p2), %v646_v7  ;;  %v649_v12 = vld [vmem:[%s779_s3 + $0x18] sm:$0xff] (!%p189_p2)   ;;  %v644_v13 = vld [vmem:[%s777_s1 + $0x30] sm:$0xff] (!%p189_p2)   ;;  %v650_v14 = vld [vmem:[%s779_s3 + $0x20] sm:$0xff] (!%p189_p2)  }
   0x9   : > { %612 = vmatprep.subr.bf16.mxu1 (!%p189_p2), %v647_v8  ;;  %v645_v15 = vld [vmem:[%s777_s1 + $0x38] sm:$0xff] (!%p189_p2)   ;;  %v651_v16 = vld [vmem:[%s779_s3 + $0x28] sm:$0xff] (!%p189_p2)   ;;  %v652_v20 = vld [vmem:[%s779_s3 + $0x30] sm:$0xff] (!%p189_p2)  }
   0xa   : > { %v653_v21 = vld [vmem:[%s779_s3 + $0x38] sm:$0xff] (!%p189_p2)   ;;  %v550_v22 = vld [vmem:[%s778_s2] ss:$0 sm:$0xff] (!%p189_p2) }
   0xb   : > { %593 = vmatpush3.bf16.msra.mxu0 (!%p189_p2), %v639_v1  ;;  %v559_v37 = vld [vmem:[%s780_s4] ss:$0 sm:$0xff] (!%p189_p2) }
   0xc   : > { %594 = vmatprep.subr.bf16.mxu0 (!%p189_p2), %v640_v2  ;;  %613 = vmatpush3.bf16.msra.mxu1 (!%p189_p2), %v647_v8 }
   0xd   : > { %s783_s22 = smov (!%p217_p3, %s546_s22), 7  ;;  %614 = vmatprep.subr.bf16.mxu1 %v648_v10 }
   0xe   : > { %s547_s27 = sshll.u32 %s783_s22, 3 }
   0xf   : > { %s717_s30 = scalar_lea.vmem %s776_s0, %s547_s27  ;;  %595 = vmatpush3.bf16.msra.mxu0 %v640_v2  ;;  %s226_s16 = scalar_lea.vmem %s781_s5, %s547_s27 }
  0x10   : > { %v229_v4 = vld [vmem:[%s717_s30] sm:$0xff]  ;;  %v230_v5 = vld [vmem:[%s717_s30 + $0x8] sm:$0xff]  ;;  %596 = vmatprep.subr.bf16.mxu0 %v641_v3  ;;  %615 = vmatpush3.bf16.msra.mxu1 %v648_v10  ;;  %v231_v17 = vld [vmem:[%s717_s30 + $0x10] sm:$0xff] }
  0x11   : > { %v233_v6 = vpack.c.bf16 %v230_v5, %v229_v4  ;;  %616 = vmatprep.subr.bf16.mxu1 %v649_v12  ;;  %v232_v18 = vld [vmem:[%s717_s30 + $0x18] sm:$0xff] }
  0x12   : > { %v234_v19 = vpack.c.bf16 %v232_v18, %v231_v17 }
  0x13   : > { %606 = vmatprep.mubr.bf16.mxu0 %v233_v6  ;;  %597 = vmatpush3.bf16.msra.mxu0 %v641_v3 }
  0x14   : > { %598 = vmatprep.subr.bf16.mxu0 %v642_v9  ;;  %617 = vmatpush3.bf16.msra.mxu1 %v649_v12 }
  0x15   : > { %618 = vmatprep.subr.bf16.mxu1 %v650_v14 }
  0x17   : > { %599 = vmatpush3.bf16.msra.mxu0 %v642_v9 }
  0x18   : > { %600 = vmatprep.subr.bf16.mxu0 %v643_v11  ;;  %619 = vmatpush3.bf16.msra.mxu1 %v650_v14 }
  0x19   : > { %620 = vmatprep.subr.bf16.mxu1 %v651_v16 }
  0x1b   : > { %601 = vmatpush3.bf16.msra.mxu0 %v643_v11 }
  0x1c   : > { %602 = vmatprep.subr.bf16.mxu0 %v644_v13  ;;  %621 = vmatpush3.bf16.msra.mxu1 %v651_v16 }
  0x1d   : > { %622 = vmatprep.subr.bf16.mxu1 %v652_v20 }
  0x1f   : > { %603 = vmatpush3.bf16.msra.mxu0 %v644_v13 }
  0x20   : > { %604 = vmatprep.subr.bf16.mxu0 %v645_v15  ;;  %623 = vmatpush3.bf16.msra.mxu1 %v652_v20 }
  0x21   : > { %624 = vmatprep.subr.bf16.mxu1 %v653_v21 }
  0x23   : > { %605 = vmatpush3.bf16.msra.mxu0 %v645_v15 }
  0x24   : > { %625 = vmatpush3.bf16.msra.mxu1 %v653_v21 }
  0x26   : > { %607 = vmatmul.mubr.bf16.vlgmr.msra.gmra.mrb[0].mxu0 %v234_v19 }
  0xf9   : > { %v608_v23 = vpop.f32.mrb[0].mxu0 }
  0xfa   : > { %v349_v24 = vadd.f32 %v608_v23, %v550_v22  ;;  %v340_v25 = vpop.f32.mrb[1].mxu0 }
  0xfb   : > { %v341_v26 = vadd.f32 %v550_v22, %v340_v25  ;;  %v609_v27 = vpop.f32.mrb[2].mxu0 }
  0xfc   : > { %v352_v28 = vadd.f32 %v609_v27, %v550_v22  ;;  %v343_v29 = vpop.f32.mrb[3].mxu0  ;;  %v357_v31 = vmax.f32 %v349_v24, 0.0 }
  0xfd   : > { %v344_v30 = vadd.f32 %v550_v22, %v343_v29  ;;  %v355_v33 = vmax.f32 %v341_v26, 0.0 }
  0xfe   : > { %v358_v32 = vmax.f32 %v352_v28, 0.0 }
  0xff   : > { %v356_v34 = vmax.f32 %v344_v30, 0.0 }
 0x100   : > { %v360_v35 = vpack.c.bf16 %v358_v32, %v357_v31 }
 0x101   : > { %v359_v36 = vpack.c.bf16 %v356_v34, %v355_v33 }
 0x103   : > { %626 = vmatprep.mubr.bf16.mxu1 %v359_v36 }
 0x104   : > { %627 = vmatmul.mubr.bf16.vlgmr.msra.gmra.mrb[0].mxu1 %v360_v35 }
 0x1d7   : > { %v628_v38 = vpop.f32.mrb[0].mxu1 }
 0x1d8   : > { %v466_v39 = vpop.f32.mrb[1].mxu1  ;;  %v475_v44 = vadd.f32 %v628_v38, %v559_v37 }
 0x1d9   : > { %v467_v40 = vadd.f32 %v559_v37, %v466_v39  ;;  %v629_v41 = vpop.f32.mrb[2].mxu1 }
 0x1da   : > { %v469_v42 = vpop.f32.mrb[3].mxu1  ;;  %v478_v45 = vadd.f32 %v629_v41, %v559_v37  ;;  %483 = vst [vmem:[%s226_s16 + $0x10] sm:$0xff] %v475_v44 }
 0x1db   : > { %481 = vst [vmem:[%s226_s16] sm:$0xff] %v467_v40  ;;  %v470_v43 = vadd.f32 %v559_v37, %v469_v42 }
 0x1dc   : > { %484 = vst [vmem:[%s226_s16 + $0x18] sm:$0xff] %v478_v45 }
 0x1dd   : > { %482 = vst [vmem:[%s226_s16 + $0x8] sm:$0xff] %v470_v43 }
 0x1de PF: > { %s15_s18 = sadd.s32 1, %s660_s18  }
 0x1df   : > { %p12_p4 = scmp.ge.s32.totalorder %s15_s18, 4  }
 0x1e1   :  { %14 = sbr.rel (!%p12_p4) target bundleno = 1 (0x1), region = 70 }

</bundles_post_ra>
